<compile_context>
chip_gen: v7x
topology: tpu7x:2x2x1
jax: 0.10.0
libtpu: 0.0.40
codegen_flags: <defaults>
</compile_context>

<pallas_src>
import functools
import math

import jax
import jax.numpy as jnp
from jax import lax
from jax.experimental import pallas as pl
from jax.experimental.pallas import tpu as pltpu

_LANE = 128
_SUBLANE = 8
_UNROLL_LAYER_LIMIT = 8     # static Python unroll up to this many hidden layers


def _round_up(x, m):
    return ((x + m - 1) // m) * m


def _nbytes(shape, dtype):
    return math.prod(shape) * jnp.dtype(dtype).itemsize


def _mlp_kernel(*refs, num_hidden_layers, compute_dtype, output_activation):
    if num_hidden_layers > 0:
        (x_ref, w_in_ref, b_in_ref, w_h_ref, b_h_ref,
         w_out_ref, b_out_ref, o_ref) = refs
    else:
        x_ref, w_in_ref, b_in_ref, w_out_ref, b_out_ref, o_ref = refs
        w_h_ref = b_h_ref = None

    init_size = x_ref.shape[-1]
    output_size = o_ref.shape[-1]

    # ---- input layer + ReLU -------------------------------------------------
    # K == init_size is tiny (2 for coordinate MLPs), so a full MXU pass would
    # be ~99% wasted work; do it on the VPU as broadcast multiply-adds, in f32
    # (keeps the input coordinates un-quantised).
    x = x_ref[...]                              # (tb, init_size) f32
    w_in = w_in_ref[...]                        # (init_size, h_pad) f32
    h = x[:, 0:1] * w_in[0:1, :] + b_in_ref[...]
    for k in range(1, init_size):
        h = h + x[:, k:k + 1] * w_in[k:k + 1, :]
    h = jnp.maximum(h, 0.0).astype(compute_dtype)   # bf16 inter-layer temp

    # ---- hidden layers + ReLU (MXU, f32 accumulate, bf16 activations) -------
    def layer(hc, w, b):
        z = jnp.dot(hc, w, preferred_element_type=jnp.float32)
        return jnp.maximum(z + b, 0.0).astype(compute_dtype)

    if 0 < num_hidden_layers <= _UNROLL_LAYER_LIMIT:
        for i in range(num_hidden_layers):                  # static unroll
            h = layer(h, w_h_ref[i], b_h_ref[i])
    elif num_hidden_layers > _UNROLL_LAYER_LIMIT:
        h = lax.fori_loop(
            0, num_hidden_layers,
            lambda i, hc: layer(hc, w_h_ref[i], b_h_ref[i]), h)

    # ---- output layer + activation -------------------------------------------
    y = jnp.dot(h, w_out_ref[...], preferred_element_type=jnp.float32)
    y = (y + b_out_ref[...])[:, :output_size]   # drop padded lanes before EUP/store
    if output_activation == "tanh":
        y = (jnp.tanh(y) + 1.0) * 0.5
    elif output_activation == "sigmoid":
        y = jax.nn.sigmoid(y)
    o_ref[...] = y.astype(o_ref.dtype)


def simple_mlp_forward(x, params, *, num_hidden_layers, block_batch=8192,
                       use_bf16_matmul=True, output_activation="tanh",
                       vmem_limit_bytes=None):
    """x: [B, init_size] float32 -> [B, output_size] float32 (SimpleMLP.forward)."""
    w_in, b_in, w_h, b_h, w_out, b_out = params
    batch, init_size = x.shape
    hidden = w_in.shape[1]
    output_size = w_out.shape[1]

    h_pad = _round_up(hidden, _LANE)
    o_pad = _round_up(output_size, _LANE)
    compute_dtype = jnp.bfloat16 if use_bf16_matmul else jnp.float32

    # ---- batch tiling: ragged last tile is masked by Pallas (no wrapper pad) --
    tb = _round_up(min(block_batch, _round_up(batch, _SUBLANE)), _SUBLANE)
    grid = (pl.cdiv(batch, tb),)

    # ---- pad parameters to lane-dense shapes (zero padding is exact) ----------
    # First-layer weight stays f32: it feeds the VPU path, not the MXU.
    w_in_p = jnp.pad(w_in, ((0, 0), (0, h_pad - hidden)))
    b_in_p = jnp.pad(b_in.reshape(1, hidden), ((0, 0), (0, h_pad - hidden)))
    w_out_p = jnp.pad(w_out, ((0, h_pad - hidden),
                              (0, o_pad - output_size))).astype(compute_dtype)
    b_out_p = jnp.pad(b_out.reshape(1, output_size),
                      ((0, 0), (0, o_pad - output_size)))

    args = [x, w_in_p, b_in_p]
    in_specs = [
        pl.BlockSpec((tb, init_size), lambda i: (i, 0)),       # x: streamed, f32
        pl.BlockSpec((init_size, h_pad), lambda i: (0, 0)),    # weights: resident
        pl.BlockSpec((1, h_pad), lambda i: (0, 0)),
    ]
    if num_hidden_layers > 0:
        w_h_p = jnp.pad(w_h, ((0, 0), (0, h_pad - hidden),
                              (0, h_pad - hidden))).astype(compute_dtype)
        b_h_p = jnp.pad(b_h.reshape(num_hidden_layers, 1, hidden),
                        ((0, 0), (0, 0), (0, h_pad - hidden)))
        args += [w_h_p, b_h_p]
        in_specs += [
            pl.BlockSpec((num_hidden_layers, h_pad, h_pad), lambda i: (0, 0, 0)),
            pl.BlockSpec((num_hidden_layers, 1, h_pad), lambda i: (0, 0, 0)),
        ]
    args += [w_out_p, b_out_p]
    in_specs += [
        pl.BlockSpec((h_pad, o_pad), lambda i: (0, 0)),
        pl.BlockSpec((1, o_pad), lambda i: (0, 0)),
    ]

    # ---- VMEM budget: resident weights (x2 buffers) + streamed blocks + temps --
    if vmem_limit_bytes is None:
        param_bytes = sum(int(a.size) * a.dtype.itemsize for a in args[1:])
        stream_bytes = 2 * (_nbytes((tb, init_size), jnp.float32)
                            + _nbytes((tb, output_size), jnp.float32))
        temp_bytes = 6 * tb * h_pad * 4          # headroom for (tb, h_pad) temporaries
        est = 2 * param_bytes + stream_bytes + temp_bytes + (4 << 20)
        vmem_limit_bytes = max(32 << 20, min(est, 64 << 20))

    # ---- advisory cost estimate ----
    flops = 2 * batch * (init_size * h_pad
                         + num_hidden_layers * h_pad * h_pad
                         + h_pad * o_pad)
    transcendentals = batch * output_size
    bytes_accessed = (_nbytes((batch, init_size), jnp.float32)
                      + sum(int(a.size) * a.dtype.itemsize for a in args[1:])
                      + _nbytes((batch, output_size), jnp.float32))

    kernel = functools.partial(_mlp_kernel,
                               num_hidden_layers=num_hidden_layers,
                               compute_dtype=compute_dtype,
                               output_activation=output_activation)

    return pl.pallas_call(
        kernel,
        out_shape=jax.ShapeDtypeStruct((batch, output_size), jnp.float32),
        grid=grid,
        in_specs=in_specs,
        # Natural-width output (last block dim == full array dim is layout-legal):
        # ~128x less HBM writeback than a padded f32 slab when output_size == 1.
        out_specs=pl.BlockSpec((tb, output_size), lambda i: (i, 0)),
        compiler_params=pltpu.CompilerParams(
            dimension_semantics=("parallel",),
            vmem_limit_bytes=int(vmem_limit_bytes)),
        cost_estimate=pl.CostEstimate(flops=flops,
                                      transcendentals=transcendentals,
                                      bytes_accessed=bytes_accessed),
    )(*args)


def init_params(key, *, init_size, hidden_size, num_hidden_layers, output_size):
    """nn.Linear-style U(-1/sqrt(fan_in), 1/sqrt(fan_in)) init.

    Weights are stored pre-transposed as [in, out] (PyTorch stores [out, in]
    and computes x @ W.T + b); biases are 2-D / 3-D for TPU-friendly layouts.
    """
    ks = jax.random.split(key, 6)

    def unif(k, shape, fan_in):
        bound = 1.0 / jnp.sqrt(jnp.float32(fan_in))
        return jax.random.uniform(k, shape, jnp.float32, -bound, bound)

    w_in = unif(ks[0], (init_size, hidden_size), init_size)
    b_in = unif(ks[1], (1, hidden_size), init_size)
    w_h = unif(ks[2], (num_hidden_layers, hidden_size, hidden_size), hidden_size)
    b_h = unif(ks[3], (num_hidden_layers, 1, hidden_size), hidden_size)
    w_out = unif(ks[4], (hidden_size, output_size), hidden_size)
    b_out = unif(ks[5], (1, output_size), hidden_size)
    return w_in, b_in, w_h, b_h, w_out, b_out


def reference_forward(x, params, *, num_hidden_layers):
    """Pure-JAX f32 reference of the PyTorch forward for validation."""
    w_in, b_in, w_h, b_h, w_out, b_out = params
    hi = jax.lax.Precision.HIGHEST
    h = jnp.maximum(jnp.dot(x, w_in, precision=hi) + b_in, 0.0)
    for i in range(num_hidden_layers):
        h = jnp.maximum(jnp.dot(h, w_h[i], precision=hi) + b_h[i], 0.0)
    y = jnp.dot(h, w_out, precision=hi) + b_out
    return (jnp.tanh(y) + 1.0) * 0.5


def _run_case(key, *, batch, init_size, hidden_size, num_hidden_layers,
              output_size, block_batch, check_f32):
    kx, kp = jax.random.split(key)
    x = jax.random.normal(kx, (batch, init_size), jnp.float32)
    params = init_params(kp, init_size=init_size, hidden_size=hidden_size,
                         num_hidden_layers=num_hidden_layers,
                         output_size=output_size)
    ref = reference_forward(x, params, num_hidden_layers=num_hidden_layers)

    if check_f32:
        out = jax.block_until_ready(simple_mlp_forward(
            x, params, num_hidden_layers=num_hidden_layers,
            block_batch=block_batch, use_bf16_matmul=False))
        assert out.shape == (batch, output_size)
        assert jnp.allclose(out, ref, atol=5e-4, rtol=5e-4), "f32 path mismatch"

    out = jax.block_until_ready(simple_mlp_forward(
        x, params, num_hidden_layers=num_hidden_layers,
        block_batch=block_batch, use_bf16_matmul=True))
    assert out.shape == (batch, output_size)
    assert jnp.allclose(out, ref, atol=5e-2, rtol=5e-2), "bf16 path mismatch"


if __name__ == "__main__":
    key = jax.random.PRNGKey(0)
    k1, k2, k3 = jax.random.split(key, 3)

    # Several batch tiles + a masked ragged remainder; static-unrolled layer path.
    _run_case(k1, batch=200, init_size=2, hidden_size=32, num_hidden_layers=3,
              output_size=1, block_batch=64, check_f32=True)
    # Deep net -> lax.fori_loop hidden-layer path with dynamic weight indexing.
    _run_case(k2, batch=130, init_size=2, hidden_size=32, num_hidden_layers=10,
              output_size=1, block_batch=64, check_f32=False)
    # No hidden layers (no dummy weight block) and a multi-column narrow output.
    _run_case(k3, batch=40, init_size=2, hidden_size=32, num_hidden_layers=0,
              output_size=3, block_batch=64, check_f32=False)

    print("KERNEL_OK")
</pallas_src>

<mosaic_0001>
module attributes {stable_mosaic.version = 11 : i64} {
  func.func @_mlp_kernel(%arg0: i32, %arg1: memref<64x2xf32, #tpu.memory_space<vmem>>, %arg2: memref<2x128xf32, #tpu.memory_space<vmem>>, %arg3: memref<1x128xf32, #tpu.memory_space<vmem>>, %arg4: memref<3x128x128xf32, #tpu.memory_space<vmem>>, %arg5: memref<3x1x128xf32, #tpu.memory_space<vmem>>, %arg6: memref<128x128xf32, #tpu.memory_space<vmem>>, %arg7: memref<1x128xf32, #tpu.memory_space<vmem>>, %arg8: memref<64x1xf32, #tpu.memory_space<vmem>>) attributes {dimension_semantics = [#tpu.dimension_semantics<parallel>], iteration_bounds = array<i64: 4>, scalar_prefetch = 0 : i64, scratch_operands = 0 : i64, tpu.core_type = #tpu.core_type<tc>, window_params = [{transform_indices = @transform_0, window_bounds = array<i64: 64, 2>}, {pipeline_mode = #tpu.pipeline_mode<synchronous>, transform_indices = @transform_1, window_bounds = array<i64: 2, 128>}, {pipeline_mode = #tpu.pipeline_mode<synchronous>, transform_indices = @transform_2, window_bounds = array<i64: 1, 128>}, {pipeline_mode = #tpu.pipeline_mode<synchronous>, transform_indices = @transform_3, window_bounds = array<i64: 3, 128, 128>}, {pipeline_mode = #tpu.pipeline_mode<synchronous>, transform_indices = @transform_4, window_bounds = array<i64: 3, 1, 128>}, {pipeline_mode = #tpu.pipeline_mode<synchronous>, transform_indices = @transform_5, window_bounds = array<i64: 128, 128>}, {pipeline_mode = #tpu.pipeline_mode<synchronous>, transform_indices = @transform_6, window_bounds = array<i64: 1, 128>}, {transform_indices = @transform_7, window_bounds = array<i64: 64, 1>}]} {
    %c0 = arith.constant 0 : index
    %c0_0 = arith.constant 0 : index
    %0 = vector.load %arg1[%c0, %c0_0] : memref<64x2xf32, #tpu.memory_space<vmem>>, vector<64x2xf32>
    %c0_1 = arith.constant 0 : index
    %c0_2 = arith.constant 0 : index
    %1 = vector.load %arg2[%c0_1, %c0_2] : memref<2x128xf32, #tpu.memory_space<vmem>>, vector<2x128xf32>
    %2 = vector.extract_strided_slice %0 {offsets = [0, 0], sizes = [64, 1], strides = [1, 1]} : vector<64x2xf32> to vector<64x1xf32>
    %3 = vector.extract_strided_slice %1 {offsets = [0, 0], sizes = [1, 128], strides = [1, 1]} : vector<2x128xf32> to vector<1x128xf32>
    %4 = vector.broadcast %2 : vector<64x1xf32> to vector<64x128xf32>
    %5 = vector.broadcast %3 : vector<1x128xf32> to vector<64x128xf32>
    %6 = arith.mulf %4, %5 : vector<64x128xf32>
    %c0_3 = arith.constant 0 : index
    %c0_4 = arith.constant 0 : index
    %7 = vector.load %arg3[%c0_3, %c0_4] : memref<1x128xf32, #tpu.memory_space<vmem>>, vector<1x128xf32>
    %8 = vector.broadcast %7 : vector<1x128xf32> to vector<64x128xf32>
    %9 = arith.addf %6, %8 : vector<64x128xf32>
    %10 = vector.extract_strided_slice %0 {offsets = [0, 1], sizes = [64, 1], strides = [1, 1]} : vector<64x2xf32> to vector<64x1xf32>
    %11 = vector.extract_strided_slice %1 {offsets = [1, 0], sizes = [1, 128], strides = [1, 1]} : vector<2x128xf32> to vector<1x128xf32>
    %12 = vector.broadcast %10 : vector<64x1xf32> to vector<64x128xf32>
    %13 = vector.broadcast %11 : vector<1x128xf32> to vector<64x128xf32>
    %14 = arith.mulf %12, %13 : vector<64x128xf32>
    %15 = arith.addf %9, %14 : vector<64x128xf32>
    %cst = arith.constant 0.000000e+00 : f32
    %16 = vector.broadcast %cst : f32 to vector<64x128xf32>
    %17 = arith.maximumf %15, %16 : vector<64x128xf32>
    %c0_5 = arith.constant 0 : index
    %c0_6 = arith.constant 0 : index
    %c0_7 = arith.constant 0 : index
    %18 = vector.load %arg4[%c0_5, %c0_6, %c0_7] : memref<3x128x128xf32, #tpu.memory_space<vmem>>, vector<1x128x128xf32>
    %19 = vector.shape_cast %18 : vector<1x128x128xf32> to vector<128x128xf32>
    %c0_8 = arith.constant 0 : index
    %c0_9 = arith.constant 0 : index
    %c0_10 = arith.constant 0 : index
    %20 = vector.load %arg5[%c0_8, %c0_9, %c0_10] : memref<3x1x128xf32, #tpu.memory_space<vmem>>, vector<1x1x128xf32>
    %21 = vector.shape_cast %20 : vector<1x1x128xf32> to vector<1x128xf32>
    %cst_11 = arith.constant dense<0.000000e+00> : vector<64x128xf32>
    %22 = tpu.matmul %17, %19, %cst_11 {dimension_numbers = #tpu.dot_dimension_numbers<[1], [0], [0], [1], [0, 0, 1, 1], [], []>} : vector<64x128xf32>, vector<128x128xf32>, vector<64x128xf32> -> vector<64x128xf32>
    %23 = vector.broadcast %21 : vector<1x128xf32> to vector<64x128xf32>
    %24 = arith.addf %22, %23 : vector<64x128xf32>
    %cst_12 = arith.constant 0.000000e+00 : f32
    %25 = vector.broadcast %cst_12 : f32 to vector<64x128xf32>
    %26 = arith.maximumf %24, %25 : vector<64x128xf32>
    %c1 = arith.constant 1 : index
    %c0_13 = arith.constant 0 : index
    %c0_14 = arith.constant 0 : index
    %27 = vector.load %arg4[%c1, %c0_13, %c0_14] : memref<3x128x128xf32, #tpu.memory_space<vmem>>, vector<1x128x128xf32>
    %28 = vector.shape_cast %27 : vector<1x128x128xf32> to vector<128x128xf32>
    %c1_15 = arith.constant 1 : index
    %c0_16 = arith.constant 0 : index
    %c0_17 = arith.constant 0 : index
    %29 = vector.load %arg5[%c1_15, %c0_16, %c0_17] : memref<3x1x128xf32, #tpu.memory_space<vmem>>, vector<1x1x128xf32>
    %30 = vector.shape_cast %29 : vector<1x1x128xf32> to vector<1x128xf32>
    %cst_18 = arith.constant dense<0.000000e+00> : vector<64x128xf32>
    %31 = tpu.matmul %26, %28, %cst_18 {dimension_numbers = #tpu.dot_dimension_numbers<[1], [0], [0], [1], [0, 0, 1, 1], [], []>} : vector<64x128xf32>, vector<128x128xf32>, vector<64x128xf32> -> vector<64x128xf32>
    %32 = vector.broadcast %30 : vector<1x128xf32> to vector<64x128xf32>
    %33 = arith.addf %31, %32 : vector<64x128xf32>
    %cst_19 = arith.constant 0.000000e+00 : f32
    %34 = vector.broadcast %cst_19 : f32 to vector<64x128xf32>
    %35 = arith.maximumf %33, %34 : vector<64x128xf32>
    %c2 = arith.constant 2 : index
    %c0_20 = arith.constant 0 : index
    %c0_21 = arith.constant 0 : index
    %36 = vector.load %arg4[%c2, %c0_20, %c0_21] : memref<3x128x128xf32, #tpu.memory_space<vmem>>, vector<1x128x128xf32>
    %37 = vector.shape_cast %36 : vector<1x128x128xf32> to vector<128x128xf32>
    %c2_22 = arith.constant 2 : index
    %c0_23 = arith.constant 0 : index
    %c0_24 = arith.constant 0 : index
    %38 = vector.load %arg5[%c2_22, %c0_23, %c0_24] : memref<3x1x128xf32, #tpu.memory_space<vmem>>, vector<1x1x128xf32>
    %39 = vector.shape_cast %38 : vector<1x1x128xf32> to vector<1x128xf32>
    %cst_25 = arith.constant dense<0.000000e+00> : vector<64x128xf32>
    %40 = tpu.matmul %35, %37, %cst_25 {dimension_numbers = #tpu.dot_dimension_numbers<[1], [0], [0], [1], [0, 0, 1, 1], [], []>} : vector<64x128xf32>, vector<128x128xf32>, vector<64x128xf32> -> vector<64x128xf32>
    %41 = vector.broadcast %39 : vector<1x128xf32> to vector<64x128xf32>
    %42 = arith.addf %40, %41 : vector<64x128xf32>
    %cst_26 = arith.constant 0.000000e+00 : f32
    %43 = vector.broadcast %cst_26 : f32 to vector<64x128xf32>
    %44 = arith.maximumf %42, %43 : vector<64x128xf32>
    %c0_27 = arith.constant 0 : index
    %c0_28 = arith.constant 0 : index
    %45 = vector.load %arg6[%c0_27, %c0_28] : memref<128x128xf32, #tpu.memory_space<vmem>>, vector<128x128xf32>
    %cst_29 = arith.constant dense<0.000000e+00> : vector<64x128xf32>
    %46 = tpu.matmul %44, %45, %cst_29 {dimension_numbers = #tpu.dot_dimension_numbers<[1], [0], [0], [1], [0, 0, 1, 1], [], []>} : vector<64x128xf32>, vector<128x128xf32>, vector<64x128xf32> -> vector<64x128xf32>
    %c0_30 = arith.constant 0 : index
    %c0_31 = arith.constant 0 : index
    %47 = vector.load %arg7[%c0_30, %c0_31] : memref<1x128xf32, #tpu.memory_space<vmem>>, vector<1x128xf32>
    %48 = vector.broadcast %47 : vector<1x128xf32> to vector<64x128xf32>
    %49 = arith.addf %46, %48 : vector<64x128xf32>
    %50 = vector.extract_strided_slice %49 {offsets = [0, 0], sizes = [64, 1], strides = [1, 1]} : vector<64x128xf32> to vector<64x1xf32>
    %51 = math.tanh %50 : vector<64x1xf32>
    %cst_32 = arith.constant 1.000000e+00 : f32
    %52 = vector.broadcast %cst_32 : f32 to vector<64x1xf32>
    %53 = arith.addf %51, %52 : vector<64x1xf32>
    %cst_33 = arith.constant 5.000000e-01 : f32
    %54 = vector.broadcast %cst_33 : f32 to vector<64x1xf32>
    %55 = arith.mulf %53, %54 : vector<64x1xf32>
    %c0_34 = arith.constant 0 : index
    %c0_35 = arith.constant 0 : index
    %56 = vector.load %arg8[%c0_34, %c0_35] : memref<64x1xf32, #tpu.memory_space<vmem>>, vector<64x1xf32>
    tpu.vector_store %arg8[%c0_34, %c0_35], %55 {strides = array<i32>} : memref<64x1xf32, #tpu.memory_space<vmem>>, vector<64x1xf32>,
    return
  }
  func.func @transform_0(%arg0: i32) -> (i32, i32) {
    %c0_i32 = arith.constant 0 : i32
    %c0_i32_0 = arith.constant 0 : i32
    return %arg0, %c0_i32 : i32, i32
  }
  func.func @transform_1(%arg0: i32) -> (i32, i32) {
    %c0_i32 = arith.constant 0 : i32
    %c0_i32_0 = arith.constant 0 : i32
    %c0_i32_1 = arith.constant 0 : i32
    return %c0_i32, %c0_i32_0 : i32, i32
  }
  func.func @transform_2(%arg0: i32) -> (i32, i32) {
    %c0_i32 = arith.constant 0 : i32
    %c0_i32_0 = arith.constant 0 : i32
    %c0_i32_1 = arith.constant 0 : i32
    return %c0_i32, %c0_i32_0 : i32, i32
  }
  func.func @transform_3(%arg0: i32) -> (i32, i32, i32) {
    %c0_i32 = arith.constant 0 : i32
    %c0_i32_0 = arith.constant 0 : i32
    %c0_i32_1 = arith.constant 0 : i32
    %c0_i32_2 = arith.constant 0 : i32
    return %c0_i32, %c0_i32_0, %c0_i32_1 : i32, i32, i32
  }
  func.func @transform_4(%arg0: i32) -> (i32, i32, i32) {
    %c0_i32 = arith.constant 0 : i32
    %c0_i32_0 = arith.constant 0 : i32
    %c0_i32_1 = arith.constant 0 : i32
    %c0_i32_2 = arith.constant 0 : i32
    return %c0_i32, %c0_i32_0, %c0_i32_1 : i32, i32, i32
  }
  func.func @transform_5(%arg0: i32) -> (i32, i32) {
    %c0_i32 = arith.constant 0 : i32
    %c0_i32_0 = arith.constant 0 : i32
    %c0_i32_1 = arith.constant 0 : i32
    return %c0_i32, %c0_i32_0 : i32, i32
  }
  func.func @transform_6(%arg0: i32) -> (i32, i32) {
    %c0_i32 = arith.constant 0 : i32
    %c0_i32_0 = arith.constant 0 : i32
    %c0_i32_1 = arith.constant 0 : i32
    return %c0_i32, %c0_i32_0 : i32, i32
  }
  func.func @transform_7(%arg0: i32) -> (i32, i32) {
    %c0_i32 = arith.constant 0 : i32
    %c0_i32_0 = arith.constant 0 : i32
    return %arg0, %c0_i32 : i32, i32
  }
}

</mosaic_0001>

<bundles_post_ra>
// kernel: tpu_custom_call.1
= control target key start
LH: loop header
LB: loop body
LE: loop exit
PB: predicated region body
PF: predicated region fallthrough
CT: control target
= control target key end

     0   :  { %12 = vsyncpa [#allocation3], 0  ;;  %s2010_s24 = smov 0   ;;  %s2012_s25 = smov 0   ;;  %s2249_s0 = inlined_call_operand.vmem [shape: f32[200,2], index: 0, kind: input, shape index: {}]   ;;  %s2250_s1 = inlined_call_operand.vmem [shape: f32[2,128], index: 1, kind: input, shape index: {}]   ;;  %s2251_s2 = inlined_call_operand.vmem [shape: f32[1,128], index: 2, kind: input, shape index: {}]   ;;  %s2252_s3 = inlined_call_operand.hbm [shape: f32[3,128,128], index: 3, kind: input, shape index: {}]   ;;  %s2253_s4 = inlined_call_operand.vmem [shape: f32[3,1,128], index: 4, kind: input, shape index: {}]   ;;  %s2254_s5 = inlined_call_operand.vmem [shape: f32[128,128], index: 5, kind: input, shape index: {}]   ;;  %s2255_s6 = inlined_call_operand.vmem [shape: f32[1,128], index: 6, kind: input, shape index: {}]   ;;  %s2256_s7 = inlined_call_operand.vmem [shape: f32[200,1], index: 7, kind: output, shape index: {}]  }
   0x1   :  { %s2014_s26 = smov 0  }
   0x2 LB: > { %s2023_s27 = sadd.s32 4294967295, %s1931_s26   ;;  %s2025_s28 = sadd.s32 1, %s1931_s26   ;;  %s1931_s26 = sphi %s2014_s26, %s2271_s26   ;;  %s1927_s25 = sphi %s2012_s25, %s2270_s25   ;;  %s1923_s24 = sphi %s2010_s24, %s2269_s24  }
   0x3   : > { %s174_s29 = ssub.s32 %s1931_s26, %s2025_s28  ;;  %s177_s30 = sadd.s32 1, %s1927_s25 }
   0x4   : > { %p175_p0 = scmp.eq.s32.totalorder %s174_s29, 0  ;;  %p187_p1 = scmp.ne.s32.totalorder %s1927_s25, %s1923_s24 }
   0x5   : > { %p188_p2 = scmp.eq.s32.totalorder %s2023_s27, 3  ;;  %p1280_p3 = scmp.ge.s32.totalorder %s1931_s26, 1 }
   0x6   : > { %s2033_s8 = scalar_select %p175_p0, %s1927_s25, %s177_s30  }
   0x7   : > { %p2035_p4 = por %p188_p2, %p187_p1  ;;  %p201_p5 = scmp.lt.s32.totalorder %s1931_s26, 5 }
   0x8   : > { %p2257_p6 = scmp.eq.s32.totalorder %s2023_s27, 0  ;;  %s1965_s11 = smov [#allocation2]  }
   0x9   : > { %s2259_s9 = scalar_select %p2035_p4, 1, 0 }
   0xa   : > { %p2040_p7 = pnand %p1280_p3, %p201_p5  ;;  %s219_s12 = sshll.u32 %s1965_s11, 4  ;;  %s220_s12 = int_to_ptr.vmem [resolvable:$true] %s219_s12 }
   0xb   : > { %s1845_s16 = scalar_lea.hbm %s2252_s3, 6144 }
   0xc   : > { %s2260_s10 = scalar_select %p2040_p7, 1, 0 }
   0xd   : > { %p1719_p8 = pneg %p2040_p7  ;;  %p1846_p10 = scmp.ne.s32.totalorder %s2252_s3, %s1845_s16 }
   0xe   : > { %p1852_p0 = scmp.lt.u32.totalorder %s1845_s16, %s2252_s3 }
   0xf   : > { %p2048_p9 = pnand %p2257_p6, %p1719_p8 }
  0x11   : > { %p1847_p11 = pneg %p2048_p9 }
  0x13   : > { %p1848_p12 = pnand %p1847_p11, %p1846_p10 }
  0x15   : > { %p1849_p13 = pneg %p1848_p12 }
  0x17   : > { %p1854_p1 = pnand %p1852_p0, %p1849_p13 }
  0x19   : > { %1857 = shalt.err (!%p1854_p1)
}
  0x1a   : > { %s1858_s21 = scalar_lea.vmem %s220_s12, 6144  ;;  %p1866_p8 = scmp.lt.s32.totalorder %s220_s12, %s220_s12 }
  0x1b   : > { %p1859_p2 = scmp.ne.s32.totalorder %s220_s12, %s1858_s21  ;;  %p1867_p6 = scmp.lt.s32.totalorder %s1858_s21, %s1858_s21 }
  0x1d   : > { %p1861_p3 = pnand %p1859_p2, %p1847_p11  ;;  %p1868_p4 = por %p1867_p6, %p1866_p8 }
  0x1f   : > { %p1862_p5 = pneg %p1861_p3 }
  0x21   : > { %p1869_p7 = pnand %p1868_p4, %p1862_p5 }
  0x23   : > { %1872 = shalt.err (!%p1869_p7)
}
  0x24   : > { %s1966_s22 = smov 128   ;;  %s1967_s23 = smov 8  }
  0x25   : > { %1722 = dma.hbm_to_vmem [thread:$0]  (!%p2048_p9), %s2252_s3, 6144, %s220_s12, [#allocation3], %s1966_s22, %s1966_s22, %s1967_s23  }
  0x26   : > { %p2262_p10 = scmp.ne.s32.totalorder %s2260_s10, 0 }
  0x27   : > { %p2263_p12 = scmp.eq.s32.totalorder (!%p2262_p10), %s2023_s27, 0 }
  0x28   : > { %261 = sbr.rel (%p2262_p10) target bundleno = 1162 (0x48a), region = 48 }
  0x2f   : > { %1918 = dma.done.wait (%p2263_p12), [#allocation3], 6144   ;;  %p2264_p11 = pmov %p2263_p12 }
  0x30   : > { %s2075_s30 = sshll.u32 %s2023_s27, 3  ;;  %v1968_v0 = vmov 1   ;;  %v1969_v1 = vmov 0   ;;  %v451_v5 = vld [vmem:[#allocation2] sm:$0xff]  ;;  %v452_v6 = vld [vmem:[#allocation2 + $0x8] sm:$0xff]  ;;  %v453_v7 = vld [vmem:[#allocation2 + $0x10] sm:$0xff]  ;;  %v364_v55 = vlaneseq }
  0x31   : > { %1920 = vsyncadd (%p2264_p11), [#allocation3], 4294961152  ;;  %1819 = vset.pattern.permute.xlu1 %v1968_v0  ;;  %1818 = vset.pattern.permute.xlu0 %v1969_v1  ;;  %p301_p4 = scmp.lt.s32.totalorder %s2075_s30, 24  ;;  %v454_v8 = vld [vmem:[#allocation2 + $0x18] sm:$0xff]  ;;  %v1587_v9 = vpack.c.bf16 %v452_v6, %v451_v5  ;;  %v455_v11 = vld [vmem:[#allocation2 + $0x20] sm:$0xff]  ;;  %vm1015_vm0 = vcmask 7168  }
  0x32   : > { %v1591_v10 = vpack.c.bf16 %v454_v8, %v453_v7  ;;  %v456_v12 = vld [vmem:[#allocation2 + $0x28] sm:$0xff]  ;;  %v457_v15 = vld [vmem:[#allocation2 + $0x30] sm:$0xff]  ;;  %v458_v16 = vld [vmem:[#allocation2 + $0x38] sm:$0xff]  ;;  %v365_v56 = vshrl.u32 %v364_v55, 7  ;;  %p2265_p6 = scmp.ne.s32.totalorder %s2259_s9, 0 }
  0x33   : > { %s302_s10 = scalar_select %p301_p4, %s2075_s30, 24  ;;  %1588 = vmatprep.subr.bf16.mxu0 %v1587_v9  ;;  %v1595_v14 = vpack.c.bf16 %v456_v12, %v455_v11  ;;  %v1599_v17 = vpack.c.bf16 %v458_v16, %v457_v15  ;;  %v459_v18 = vld [vmem:[#allocation2 + $0x40] sm:$0xff]  ;;  %v460_v19 = vld [vmem:[#allocation2 + $0x48] sm:$0xff]  ;;  %v461_v23 = vld [vmem:[#allocation2 + $0x50] sm:$0xff] }
  0x34   : > { %1590 = vmatpush3.bf16.msra.mxu0 %v1587_v9  ;;  %v1603_v22 = vpack.c.bf16 %v460_v19, %v459_v18  ;;  %v462_v24 = vld [vmem:[#allocation2 + $0x58] sm:$0xff]  ;;  %v463_v27 = vld [vmem:[#allocation2 + $0x60] sm:$0xff]  ;;  %v464_v28 = vld [vmem:[#allocation2 + $0x68] sm:$0xff]  ;;  %v366_v57 = vsub.s32 0, %v365_v56  ;;  %v425_v59 = vsub.s32 1, %v365_v56 }
  0x35   : > { %s1287_s11 = sshll.u32 %s302_s10, 3  ;;  %1592 = vmatprep.subr.bf16.mxu0 %v1591_v10  ;;  %v1607_v26 = vpack.c.bf16 %v462_v24, %v461_v23  ;;  %v1611_v29 = vpack.c.bf16 %v464_v28, %v463_v27  ;;  %v465_v30 = vld [vmem:[#allocation2 + $0x70] sm:$0xff]  ;;  %v466_v31 = vld [vmem:[#allocation2 + $0x78] sm:$0xff]  ;;  %v588_v34 = vld [vmem:[#allocation2 + $0x80] sm:$0xff] }
  0x36   : > { %s2084_s14 = scalar_lea.vmem %s2249_s0, %s1287_s11  ;;  %v1615_v32 = vpack.c.bf16 %v466_v31, %v465_v30  ;;  %v589_v35 = vld [vmem:[#allocation2 + $0x88] sm:$0xff]  ;;  %v590_v36 = vld [vmem:[#allocation2 + $0x90] sm:$0xff]  ;;  %v591_v38 = vld [vmem:[#allocation2 + $0x98] sm:$0xff]  ;;  %s293_s11 = sand.u32 1, %s1923_s24  }
  0x37   : > { %v315_v2 = vld [vmem:[%s2084_s14] sm:$0xff]  ;;  %v316_v3 = vld [vmem:[%s2084_s14 + $0x8] sm:$0xff]  ;;  %v317_v4 = vld [vmem:[%s2084_s14 + $0x10] sm:$0xff]  ;;  %v1619_v37 = vpack.c.bf16 %v589_v35, %v588_v34  ;;  %v1623_v39 = vpack.c.bf16 %v591_v38, %v590_v36  ;;  %s1285_s12 = sshll.u32 %s293_s11, 6  ;;  %s1032_s24 = ssub.s32 (%p2265_p6), 25, %s2075_s30 }
  0x38   : > { %392 = vperm.xlu1 %1819, %v315_v2   ;;  %326 = vperm.xlu0 %1818, %v315_v2   ;;  %v318_v13 = vld [vmem:[%s2084_s14 + $0x18] sm:$0xff]  ;;  %v320_v20 = vld [vmem:[%s2084_s14 + $0x28] sm:$0xff]  ;;  %v319_v21 = vld [vmem:[%s2084_s14 + $0x20] sm:$0xff]  ;;  %s2170_s13 = scalar_lea.vmem [#allocation4], %s1285_s12   ;;  %p1033_p7 = scmp.lt.s32.totalorder (%p2265_p6), %s1032_s24, 8 }
  0x39   : > { %1594 = vmatpush3.bf16.msra.mxu0 %v1591_v10  ;;  %v321_v25 = vld [vmem:[%s2084_s14 + $0x30] sm:$0xff]  ;;  %v322_v33 = vld [vmem:[%s2084_s14 + $0x38] sm:$0xff]  ;;  %v592_v40 = vld [vmem:[#allocation2 + $0xa0] sm:$0xff]  ;;  %1620 = vmatprep.subr.bf16.mxu1 %v1619_v37  ;;  %s1312_s14 = sshll.u32 (%p2265_p6), %s2023_s27, 6 }
  0x3a   : > { %1596 = vmatprep.subr.bf16.mxu0 %v1595_v14  ;;  %v593_v41 = vld [vmem:[#allocation2 + $0xa8] sm:$0xff]  ;;  %1622 = vmatpush3.bf16.msra.mxu1 %v1619_v37  ;;  %v594_v43 = vld [vmem:[#allocation2 + $0xb0] sm:$0xff]  ;;  %v595_v44 = vld [vmem:[#allocation2 + $0xb8] sm:$0xff]  ;;  %s2195_s17 = scalar_lea.vmem (%p2265_p6), %s2256_s7, %s1312_s14  }
  0x3b   : > { %1624 = vmatprep.subr.bf16.mxu1 %v1623_v39  ;;  %v1627_v42 = vpack.c.bf16 %v593_v41, %v592_v40  ;;  %v1631_v45 = vpack.c.bf16 %v595_v44, %v594_v43  ;;  %v596_v46 = vld [vmem:[#allocation2 + $0xc0] sm:$0xff]  ;;  %v597_v47 = vld [vmem:[#allocation2 + $0xc8] sm:$0xff]  ;;  %v598_v49 = vld [vmem:[#allocation2 + $0xd0] sm:$0xff] }
  0x3c   : > { %396 = vperm.xlu1 %1819, %v316_v3   ;;  %1821 = vset.pattern.permute.xlu0 %v1968_v0  ;;  %v1635_v48 = vpack.c.bf16 %v597_v47, %v596_v46  ;;  %v599_v50 = vld [vmem:[#allocation2 + $0xd8] sm:$0xff]  ;;  %v600_v52 = vld [vmem:[#allocation2 + $0xe0] sm:$0xff]  ;;  %v601_v53 = vld [vmem:[#allocation2 + $0xe8] sm:$0xff] }
  0x3d   : > { %400 = vperm.xlu0 %1821, %v317_v4   ;;  %1598 = vmatpush3.bf16.msra.mxu0 %v1595_v14  ;;  %v1639_v51 = vpack.c.bf16 %v599_v50, %v598_v49  ;;  %v1643_v54 = vpack.c.bf16 %v601_v53, %v600_v52  ;;  %v323_v58 = vld [vmem:[%s2250_s1] sm:$0x3]  ;;  %v602_v55 = vld [vmem:[#allocation2 + $0xf0] sm:$0xff]  ;;  %v603_v56 = vld [vmem:[#allocation2 + $0xf8] sm:$0xff] }
  0x3e   : > { %1600 = vmatprep.subr.bf16.mxu0 %v1599_v17  ;;  %1626 = vmatpush3.bf16.msra.mxu1 %v1623_v39  ;;  %v367_v60 = vrot.slane %v323_v58, %v366_v57  ;;  %v426_v61 = vrot.slane %v323_v58, %v425_v59  ;;  %v1647_v57 = vpack.c.bf16 %v603_v56, %v602_v55  ;;  %v726_v58 = vld [vmem:[#allocation2 + $0x100] sm:$0xff]  ;;  %v727_v59 = vld [vmem:[#allocation2 + $0x108] sm:$0xff] }
  0x3f   : > { %1628 = vmatprep.subr.bf16.mxu1 %v1627_v42  ;;  %v871_v55 = vld [vmem:[%s2254_s5 + $0x40] sm:$0xff]  ;;  %v872_v56 = vld [vmem:[%s2254_s5 + $0x48] sm:$0xff] }
  0x40   : > { %1820 = vset.pattern.permute.xlu1 %v1969_v1 }
  0x41   : > { %341 = vperm.xlu1 %1820, %v318_v13   ;;  %1822 = vset.pattern.permute.xlu0 %v1969_v1 }
  0x42   : > { %331 = vperm.xlu0 %1822, %v316_v3   ;;  %1602 = vmatpush3.bf16.msra.mxu0 %v1599_v17 }
  0x43   : > { %1604 = vmatprep.subr.bf16.mxu0 %v1603_v22  ;;  %1630 = vmatpush3.bf16.msra.mxu1 %v1627_v42 }
  0x44   : > { %1632 = vmatprep.subr.bf16.mxu1 %v1631_v45 }
  0x45   : > { %1823 = vset.pattern.permute.xlu1 %v1968_v0 }
  0x46   : > { %404 = vperm.xlu1 %1823, %v318_v13   ;;  %336 = vperm.xlu0 %1822, %v317_v4  }
  0x47   : > { %1606 = vmatpush3.bf16.msra.mxu0 %v1603_v22  ;;  %1634 = vmatpush3.bf16.msra.mxu1 %v1631_v45 }
  0x48   : > { %1608 = vmatprep.subr.bf16.mxu0 %v1607_v26  ;;  %1636 = vmatprep.subr.bf16.mxu1 %v1635_v48 }
  0x4a   : > { %1824 = vset.pattern.permute.xlu1 %v1969_v1  ;;  %351 = vperm.xlu0 %1822, %v320_v20  }
  0x4b   : > { %346 = vperm.xlu1 %1824, %v319_v21   ;;  %1610 = vmatpush3.bf16.msra.mxu0 %v1607_v26 }
  0x4c   : > { %1612 = vmatprep.subr.bf16.mxu0 %v1611_v29  ;;  %1638 = vmatpush3.bf16.msra.mxu1 %v1635_v48 }
  0x4d   : > { %1640 = vmatprep.subr.bf16.mxu1 %v1639_v51 }
  0x4e   : > { %356 = vperm.xlu0 %1822, %v321_v25  }
  0x4f   : > { %1825 = vset.pattern.permute.xlu1 %v1968_v0  ;;  %1614 = vmatpush3.bf16.msra.mxu0 %v1611_v29 }
  0x50   : > { %408 = vperm.xlu1 %1825, %v319_v21   ;;  %1616 = vmatprep.subr.bf16.mxu0 %v1615_v32 }
  0x51   : > { %1642 = vmatpush3.bf16.msra.mxu1 %v1639_v51 }
  0x52   : > { %1827 = vset.pattern.permute.xlu0 %v1968_v0  ;;  %1644 = vmatprep.subr.bf16.mxu1 %v1643_v54 }
  0x53   : > { %416 = vperm.xlu0 %1827, %v321_v25   ;;  %1618 = vmatpush3.bf16.msra.mxu0 %v1615_v32 }
  0x54   : > { %412 = vperm.xlu1 %1825, %v320_v20  }
  0x55   : > { %1646 = vmatpush3.bf16.msra.mxu1 %v1643_v54 }
  0x56   : > { %1648 = vmatprep.subr.bf16.mxu1 %v1647_v57 }
  0x58   : > { %1826 = vset.pattern.permute.xlu1 %v1969_v1 }
  0x59   : > { %361 = vperm.xlu1 %1826, %v322_v33   ;;  %1650 = vmatpush3.bf16.msra.mxu1 %v1647_v57  ;;  %v1699_v57 = vpack.c.bf16 %v872_v56, %v871_v55 }
  0x5d   : > { %1828 = vset.pattern.permute.xlu1 %v1968_v0  ;;  %v1288_v0 = vld [vmem:[%s2251_s2] ss:$0 sm:$0xff] }
  0x5e   : > { %420 = vperm.xlu1 %1828, %v322_v33  }
  0xb7   : > { %v393_v62 = vpop.permute.xlu1 %392  ;;  %v327_v63 = vpop.permute.xlu0 %326 }
  0xb8   : > { %v368_v1 = vmul.f32 %v367_v60, %v327_v63  ;;  %v427_v2 = vmul.f32 %v426_v61, %v393_v62  ;;  %v728_v62 = vld [vmem:[#allocation2 + $0x110] sm:$0xff]  ;;  %v1651_v63 = vpack.c.bf16 %v727_v59, %v726_v58  ;;  %v874_v59 = vld [vmem:[%s2254_s5 + $0x58] sm:$0xff] }
  0xb9   : > { %v873_v58 = vld [vmem:[%s2254_s5 + $0x50] sm:$0xff] }
  0xba   : > { %v383_v3 = vadd.f32 %v1288_v0, %v368_v1  ;;  %v729_v1 = vld [vmem:[#allocation2 + $0x118] sm:$0xff]  ;;  %1652 = vmatprep.subr.bf16.mxu0 %v1651_v63 }
  0xbb   : > { %v397_v4 = vpop.permute.xlu1 %396 }
  0xbc   : > { %v401_v5 = vpop.permute.xlu0 %400  ;;  %v435_v6 = vadd.f32 %v427_v2, %v383_v3  ;;  %v428_v12 = vmul.f32 %v426_v61, %v397_v4  ;;  %v1655_v2 = vpack.c.bf16 %v729_v1, %v728_v62  ;;  %v731_v3 = vld [vmem:[#allocation2 + $0x128] sm:$0xff]  ;;  %v733_v4 = vld [vmem:[#allocation2 + $0x138] sm:$0xff]  ;;  %v1703_v62 = vpack.c.bf16 %v874_v59, %v873_v58 }
  0xbd   : > { %v429_v16 = vmul.f32 %v426_v61, %v401_v5  ;;  %v876_v1 = vld [vmem:[%s2254_s5 + $0x68] sm:$0xff] }
  0xbe   : > { %v443_v7 = vmax.f32 %v435_v6, 0.0  ;;  %v734_v6 = vld [vmem:[#allocation2 + $0x140] sm:$0xff] }
  0xc0   : > { %v342_v8 = vpop.permute.xlu1 %341  ;;  %1443 = vmatprep.mubr.f32.mxu0 %v443_v7  ;;  %v735_v7 = vld [vmem:[#allocation2 + $0x148] sm:$0xff] }
  0xc1   : > { %v332_v9 = vpop.permute.xlu0 %331  ;;  %v371_v11 = vmul.f32 %v367_v60, %v342_v8  ;;  %v1667_v8 = vpack.c.bf16 %v735_v7, %v734_v6 }
  0xc2   : > { %v369_v10 = vmul.f32 %v367_v60, %v332_v9  ;;  %v736_v9 = vld [vmem:[#allocation2 + $0x150] sm:$0xff] }
  0xc3   : > { %v386_v20 = vadd.f32 %v1288_v0, %v371_v11 }
  0xc4   : > { %v384_v13 = vadd.f32 %v1288_v0, %v369_v10  ;;  %v737_v10 = vld [vmem:[#allocation2 + $0x158] sm:$0xff] }
  0xc5   : > { %v405_v14 = vpop.permute.xlu1 %404  ;;  %v337_v15 = vpop.permute.xlu0 %336  ;;  %v1671_v11 = vpack.c.bf16 %v737_v10, %v736_v9 }
  0xc6   : > { %v430_v17 = vmul.f32 %v426_v61, %v405_v14  ;;  %v370_v18 = vmul.f32 %v367_v60, %v337_v15  ;;  %v436_v19 = vadd.f32 %v428_v12, %v384_v13  ;;  %v738_v12 = vld [vmem:[#allocation2 + $0x160] sm:$0xff]  ;;  %v739_v13 = vld [vmem:[#allocation2 + $0x168] sm:$0xff] }
  0xc7   : > { %v1675_v14 = vpack.c.bf16 %v739_v13, %v738_v12  ;;  %v1289_v15 = vld [vmem:[%s2253_s4] ss:$0 sm:$0xff] }
  0xc8   : > { %v385_v21 = vadd.f32 %v1288_v0, %v370_v18  ;;  %v444_v22 = vmax.f32 %v436_v19, 0.0  ;;  %v438_v23 = vadd.f32 %v430_v17, %v386_v20 }
  0xc9   : > { %v352_v24 = vpop.permute.xlu0 %351 }
  0xca   : > { %v347_v25 = vpop.permute.xlu1 %346  ;;  %1444 = vmatmul.mubr.f32.vlgmr.msra.gmra.mrb[0].mxu0 %v444_v22  ;;  %v437_v26 = vadd.f32 %v429_v16, %v385_v21  ;;  %v446_v29 = vmax.f32 %v438_v23, 0.0  ;;  %v373_v33 = vmul.f32 %v367_v60, %v352_v24 }
  0xcb   : > { %v372_v27 = vmul.f32 %v367_v60, %v347_v25  ;;  %1654 = vmatpush3.bf16.msra.mxu0 %v1651_v63  ;;  %v875_v63 = vld [vmem:[%s2254_s5 + $0x60] sm:$0xff] }
  0xcc   : > { %v445_v28 = vmax.f32 %v437_v26, 0.0  ;;  %v388_v41 = vadd.f32 %v1288_v0, %v373_v33  ;;  %1656 = vmatprep.subr.bf16.mxu0 %v1655_v2 }
  0xcd   : > { %v357_v30 = vpop.permute.xlu0 %356  ;;  %v387_v34 = vadd.f32 %v1288_v0, %v372_v27 }
  0xce   : > { %1446 = vmatprep.mubr.f32.mxu0 %v445_v28  ;;  %v374_v31 = vmul.f32 %v367_v60, %v357_v30 }
  0xcf   : > { %v409_v32 = vpop.permute.xlu1 %408  ;;  %1447 = vmatmul.mubr.f32.gmra.mrb[2].mxu0 %v446_v29 }
  0xd0   : > { %v431_v35 = vmul.f32 %v426_v61, %v409_v32  ;;  %v389_v38 = vadd.f32 %v1288_v0, %v374_v31  ;;  %1658 = vmatpush3.bf16.msra.mxu0 %v1655_v2  ;;  %v1707_v2 = vpack.c.bf16 %v876_v1, %v875_v63 }
  0xd2   : > { %v439_v36 = vadd.f32 %v431_v35, %v387_v34  ;;  %v417_v37 = vpop.permute.xlu0 %416 }
  0xd3   : > { %v433_v39 = vmul.f32 %v426_v61, %v417_v37  ;;  %v413_v40 = vpop.permute.xlu1 %412 }
  0xd4   : > { %v447_v42 = vmax.f32 %v439_v36, 0.0  ;;  %v432_v43 = vmul.f32 %v426_v61, %v413_v40  ;;  %v740_v40 = vld [vmem:[#allocation2 + $0x170] sm:$0xff] }
  0xd5   : > { %v441_v44 = vadd.f32 %v433_v39, %v389_v38 }
  0xd6   : > { %v440_v45 = vadd.f32 %v432_v43, %v388_v41  ;;  %1449 = vmatprep.mubr.f32.mxu0 %v447_v42  ;;  %v741_v41 = vld [vmem:[#allocation2 + $0x178] sm:$0xff]  ;;  %v863_v43 = vld [vmem:[%s2254_s5] sm:$0xff] }
  0xd7   : > { %v449_v48 = vmax.f32 %v441_v44, 0.0  ;;  %v1679_v42 = vpack.c.bf16 %v741_v41, %v740_v40  ;;  %v864_v44 = vld [vmem:[%s2254_s5 + $0x8] sm:$0xff] }
  0xd8   : > { %v448_v46 = vmax.f32 %v440_v45, 0.0  ;;  %v362_v47 = vpop.permute.xlu1 %361  ;;  %v865_v45 = vld [vmem:[%s2254_s5 + $0x10] sm:$0xff] }
  0xd9   : > { %v375_v49 = vmul.f32 %v367_v60, %v362_v47  ;;  %v730_v60 = vld [vmem:[#allocation2 + $0x120] sm:$0xff]  ;;  %v866_v47 = vld [vmem:[%s2254_s5 + $0x18] sm:$0xff] }
  0xda   : > { %1450 = vmatmul.mubr.f32.gmra.mrb[4].mxu0 %v448_v46  ;;  %v1683_v46 = vpack.c.bf16 %v864_v44, %v863_v43 }
  0xdb   : > { %1452 = vmatprep.mubr.f32.mxu0 %v449_v48  ;;  %v390_v51 = vadd.f32 %v1288_v0, %v375_v49  ;;  %v732_v0 = vld [vmem:[#allocation2 + $0x130] sm:$0xff]  ;;  %v1687_v48 = vpack.c.bf16 %v866_v47, %v865_v45  ;;  %v867_v49 = vld [vmem:[%s2254_s5 + $0x20] sm:$0xff] }
  0xdc   : > { %v1663_v5 = vpack.c.bf16 %v733_v4, %v732_v0  ;;  %1684 = vmatprep.subr.bf16.mxu1 %v1683_v46 }
  0xdd   : > { %v421_v50 = vpop.permute.xlu1 %420 }
  0xde   : > { %v434_v52 = vmul.f32 %v426_v61, %v421_v50  ;;  %v1659_v61 = vpack.c.bf16 %v731_v3, %v730_v60  ;;  %v868_v50 = vld [vmem:[%s2254_s5 + $0x28] sm:$0xff]  ;;  %v1291_v60 = vld [vmem:[%s2253_s4 + $0x1] ss:$0 sm:$0xff] }
  0xe0   : > { %v442_v53 = vadd.f32 %v434_v52, %v390_v51  ;;  %1660 = vmatprep.subr.bf16.mxu0 %v1659_v61  ;;  %v1691_v51 = vpack.c.bf16 %v868_v50, %v867_v49  ;;  %v869_v52 = vld [vmem:[%s2254_s5 + $0x30] sm:$0xff] }
  0xe1   : > { %1662 = vmatpush3.bf16.msra.mxu0 %v1659_v61 }
  0xe2   : > { %v450_v54 = vmax.f32 %v442_v53, 0.0  ;;  %1664 = vmatprep.subr.bf16.mxu0 %v1663_v5  ;;  %v870_v53 = vld [vmem:[%s2254_s5 + $0x38] sm:$0xff] }
  0xe4   : > { %1453 = vmatmul.mubr.f32.gmra.mrb[6].mxu0 %v450_v54  ;;  %v1695_v54 = vpack.c.bf16 %v870_v53, %v869_v52  ;;  %v1294_v53 = vld [vmem:[%s2255_s6] ss:$0 sm:$0xff] }
  0xe5   : > { %1666 = vmatpush3.bf16.msra.mxu0 %v1663_v5 }
  0xe6   : > { %1668 = vmatprep.subr.bf16.mxu0 %v1667_v8 }
  0xe9   : > { %1670 = vmatpush3.bf16.msra.mxu0 %v1667_v8 }
  0xea   : > { %1672 = vmatprep.subr.bf16.mxu0 %v1671_v11 }
  0xed   : > { %1674 = vmatpush3.bf16.msra.mxu0 %v1671_v11 }
  0xee   : > { %1676 = vmatprep.subr.bf16.mxu0 %v1675_v14 }
  0xf1   : > { %1678 = vmatpush3.bf16.msra.mxu0 %v1675_v14 }
  0xf2   : > { %1680 = vmatprep.subr.bf16.mxu0 %v1679_v42 }
  0xf5   : > { %1682 = vmatpush3.bf16.msra.mxu0 %v1679_v42 }
 0x19d   : > { %v1445_v16 = vpop.f32.mrb[0].mxu0 }
 0x19e   : > { %v546_v17 = vadd.f32 %v1445_v16, %v1289_v15  ;;  %v540_v18 = vpop.f32.mrb[1].mxu0 }
 0x19f   : > { %v541_v19 = vadd.f32 %v1289_v15, %v540_v18 }
 0x1a0   : > { %v580_v21 = vmax.f32 %v546_v17, 0.0 }
 0x1a1   : > { %v579_v20 = vmax.f32 %v541_v19, 0.0 }
 0x1a2   : > { %v1448_v22 = vpop.f32.mrb[2].mxu0 }
 0x1a3   : > { %v556_v23 = vadd.f32 %v1448_v22, %v1289_v15  ;;  %v550_v24 = vpop.f32.mrb[3].mxu0  ;;  %1487 = vmatprep.mubr.f32.mxu1 %v579_v20 }
 0x1a4   : > { %v551_v25 = vadd.f32 %v1289_v15, %v550_v24  ;;  %1488 = vmatmul.mubr.f32.vlgmr.msra.gmra.mrb[0].mxu1 %v580_v21 }
 0x1a5   : > { %v582_v27 = vmax.f32 %v556_v23, 0.0  ;;  %1686 = vmatpush3.bf16.msra.mxu1 %v1683_v46 }
 0x1a6   : > { %v581_v26 = vmax.f32 %v551_v25, 0.0  ;;  %1688 = vmatprep.subr.bf16.mxu1 %v1687_v48  ;;  %v877_v25 = vld [vmem:[%s2254_s5 + $0x70] sm:$0xff] }
 0x1a8   : > { %1490 = vmatprep.mubr.f32.mxu1 %v581_v26  ;;  %v878_v26 = vld [vmem:[%s2254_s5 + $0x78] sm:$0xff] }
 0x1a9   : > { %1491 = vmatmul.mubr.f32.gmra.mrb[2].mxu1 %v582_v27  ;;  %v1711_v27 = vpack.c.bf16 %v878_v26, %v877_v25 }
 0x1aa   : > { %1690 = vmatpush3.bf16.msra.mxu1 %v1687_v48 }
 0x1ab   : > { %1692 = vmatprep.subr.bf16.mxu1 %v1691_v51 }
 0x1ad   : > { %v1451_v28 = vpop.f32.mrb[4].mxu0 }
 0x1ae   : > { %v566_v29 = vadd.f32 %v1451_v28, %v1289_v15  ;;  %v560_v30 = vpop.f32.mrb[5].mxu0  ;;  %1694 = vmatpush3.bf16.msra.mxu1 %v1691_v51  ;;  %v1293_v28 = vld [vmem:[%s2253_s4 + $0x2] ss:$0 sm:$0xff] }
 0x1af   : > { %v561_v31 = vadd.f32 %v1289_v15, %v560_v30  ;;  %1696 = vmatprep.subr.bf16.mxu1 %v1695_v54 }
 0x1b0   : > { %v584_v33 = vmax.f32 %v566_v29, 0.0 }
 0x1b1   : > { %v583_v32 = vmax.f32 %v561_v31, 0.0 }
 0x1b2   : > { %1698 = vmatpush3.bf16.msra.mxu1 %v1695_v54 }
 0x1b3   : > { %1493 = vmatprep.mubr.f32.mxu1 %v583_v32  ;;  %1700 = vmatprep.subr.bf16.mxu1 %v1699_v57 }
 0x1b4   : > { %1494 = vmatmul.mubr.f32.gmra.mrb[4].mxu1 %v584_v33 }
 0x1b6   : > { %1702 = vmatpush3.bf16.msra.mxu1 %v1699_v57 }
 0x1b7   : > { %v1454_v34 = vpop.f32.mrb[6].mxu0  ;;  %1704 = vmatprep.subr.bf16.mxu1 %v1703_v62 }
 0x1b8   : > { %v576_v35 = vadd.f32 %v1454_v34, %v1289_v15  ;;  %v570_v36 = vpop.f32.mrb[7].mxu0 }
 0x1b9   : > { %v571_v37 = vadd.f32 %v1289_v15, %v570_v36 }
 0x1ba   : > { %v586_v39 = vmax.f32 %v576_v35, 0.0  ;;  %1706 = vmatpush3.bf16.msra.mxu1 %v1703_v62 }
 0x1bb   : > { %v585_v38 = vmax.f32 %v571_v37, 0.0  ;;  %1708 = vmatprep.subr.bf16.mxu1 %v1707_v2 }
 0x1bd   : > { %1496 = vmatprep.mubr.f32.mxu1 %v585_v38 }
 0x1be   : > { %1497 = vmatmul.mubr.f32.gmra.mrb[6].mxu1 %v586_v39 }
 0x1bf   : > { %1710 = vmatpush3.bf16.msra.mxu1 %v1707_v2 }
 0x1c0   : > { %1712 = vmatprep.subr.bf16.mxu1 %v1711_v27 }
 0x1c3   : > { %1714 = vmatpush3.bf16.msra.mxu1 %v1711_v27 }
 0x277   : > { %v1489_v3 = vpop.f32.mrb[0].mxu1 }
 0x278   : > { %v684_v61 = vadd.f32 %v1489_v3, %v1291_v60  ;;  %v678_v0 = vpop.f32.mrb[1].mxu1 }
 0x279   : > { %v679_v4 = vadd.f32 %v1291_v60, %v678_v0 }
 0x27a   : > { %v718_v6 = vmax.f32 %v684_v61, 0.0 }
 0x27b   : > { %v717_v5 = vmax.f32 %v679_v4, 0.0 }
 0x27c   : > { %v1492_v7 = vpop.f32.mrb[2].mxu1 }
 0x27d   : > { %v694_v8 = vadd.f32 %v1492_v7, %v1291_v60  ;;  %v688_v9 = vpop.f32.mrb[3].mxu1  ;;  %1531 = vmatprep.mubr.f32.mxu0 %v717_v5 }
 0x27e   : > { %v689_v10 = vadd.f32 %v1291_v60, %v688_v9  ;;  %1532 = vmatmul.mubr.f32.vlgmr.msra.gmra.mrb[8].mxu0 %v718_v6 }
 0x27f   : > { %v720_v12 = vmax.f32 %v694_v8, 0.0 }
 0x280   : > { %v719_v11 = vmax.f32 %v689_v10, 0.0 }
 0x282   : > { %1534 = vmatprep.mubr.f32.mxu0 %v719_v11 }
 0x283   : > { %1535 = vmatmul.mubr.f32.gmra.mrb[10].mxu0 %v720_v12 }
 0x287   : > { %v1495_v13 = vpop.f32.mrb[4].mxu1 }
 0x288   : > { %v704_v14 = vadd.f32 %v1495_v13, %v1291_v60  ;;  %v698_v15 = vpop.f32.mrb[5].mxu1 }
 0x289   : > { %v699_v16 = vadd.f32 %v1291_v60, %v698_v15 }
 0x28a   : > { %v722_v18 = vmax.f32 %v704_v14, 0.0 }
 0x28b   : > { %v721_v17 = vmax.f32 %v699_v16, 0.0 }
 0x28d   : > { %1537 = vmatprep.mubr.f32.mxu0 %v721_v17 }
 0x28e   : > { %1538 = vmatmul.mubr.f32.gmra.mrb[12].mxu0 %v722_v18 }
 0x291   : > { %v1498_v19 = vpop.f32.mrb[6].mxu1 }
 0x292   : > { %v714_v20 = vadd.f32 %v1498_v19, %v1291_v60  ;;  %v708_v21 = vpop.f32.mrb[7].mxu1 }
 0x293   : > { %v709_v22 = vadd.f32 %v1291_v60, %v708_v21 }
 0x294   : > { %v724_v24 = vmax.f32 %v714_v20, 0.0 }
 0x295   : > { %v723_v23 = vmax.f32 %v709_v22, 0.0 }
 0x297   : > { %1540 = vmatprep.mubr.f32.mxu0 %v723_v23 }
 0x298   : > { %1541 = vmatmul.mubr.f32.gmra.mrb[14].mxu0 %v724_v24 }
 0x351   : > { %v1533_v29 = vpop.f32.mrb[8].mxu0 }
 0x352   : > { %v822_v30 = vadd.f32 %v1533_v29, %v1293_v28  ;;  %v816_v31 = vpop.f32.mrb[9].mxu0 }
 0x353   : > { %v817_v32 = vadd.f32 %v1293_v28, %v816_v31 }
 0x354   : > { %v856_v34 = vmax.f32 %v822_v30, 0.0 }
 0x355   : > { %v855_v33 = vmax.f32 %v817_v32, 0.0 }
 0x356   : > { %v1536_v35 = vpop.f32.mrb[10].mxu0 }
 0x357   : > { %v832_v36 = vadd.f32 %v1536_v35, %v1293_v28  ;;  %v826_v37 = vpop.f32.mrb[11].mxu0  ;;  %1575 = vmatprep.mubr.f32.mxu1 %v855_v33 }
 0x358   : > { %v827_v38 = vadd.f32 %v1293_v28, %v826_v37  ;;  %1576 = vmatmul.mubr.f32.vlgmr.msra.gmra.mrb[8].mxu1 %v856_v34 }
 0x359   : > { %v858_v40 = vmax.f32 %v832_v36, 0.0 }
 0x35a   : > { %v857_v39 = vmax.f32 %v827_v38, 0.0 }
 0x35c   : > { %1578 = vmatprep.mubr.f32.mxu1 %v857_v39 }
 0x35d   : > { %1579 = vmatmul.mubr.f32.gmra.mrb[10].mxu1 %v858_v40 }
 0x361   : > { %v1539_v41 = vpop.f32.mrb[12].mxu0 }
 0x362   : > { %v842_v42 = vadd.f32 %v1539_v41, %v1293_v28  ;;  %v836_v43 = vpop.f32.mrb[13].mxu0 }
 0x363   : > { %v837_v44 = vadd.f32 %v1293_v28, %v836_v43 }
 0x364   : > { %v860_v46 = vmax.f32 %v842_v42, 0.0 }
 0x365   : > { %v859_v45 = vmax.f32 %v837_v44, 0.0 }
 0x367   : > { %1581 = vmatprep.mubr.f32.mxu1 %v859_v45 }
 0x368   : > { %1582 = vmatmul.mubr.f32.gmra.mrb[12].mxu1 %v860_v46 }
 0x36b   : > { %v1542_v47 = vpop.f32.mrb[14].mxu0 }
 0x36c   : > { %v852_v48 = vadd.f32 %v1542_v47, %v1293_v28  ;;  %v846_v49 = vpop.f32.mrb[15].mxu0 }
 0x36d   : > { %v847_v50 = vadd.f32 %v1293_v28, %v846_v49 }
 0x36e   : > { %v862_v52 = vmax.f32 %v852_v48, 0.0 }
 0x36f   : > { %v861_v51 = vmax.f32 %v847_v50, 0.0 }
 0x371   : > { %1584 = vmatprep.mubr.f32.mxu1 %v861_v51 }
 0x372   : > { %1585 = vmatmul.mubr.f32.gmra.mrb[14].mxu1 %v862_v52 }
 0x42b   : > { %v1577_v54 = vpop.f32.mrb[8].mxu1 }
 0x42c   : > { %v958_v55 = vadd.f32 %v1577_v54, %v1294_v53  ;;  %v952_v56 = vpop.f32.mrb[9].mxu1 }
 0x42d   : > { %v953_v57 = vadd.f32 %v1294_v53, %v952_v56 }
 0x42e   : > { %1829 = vtanh.f32 %v958_v55 }
 0x42f   : > { %1831 = vtanh.f32 %v953_v57 }
 0x430   : > { %v1580_v58 = vpop.f32.mrb[10].mxu1 }
 0x431   : > { %v968_v59 = vadd.f32 %v1580_v58, %v1294_v53  ;;  %v962_v62 = vpop.f32.mrb[11].mxu1 }
 0x432   : > { %v963_v63 = vadd.f32 %v1294_v53, %v962_v62 }
 0x433   : > { %1833 = vtanh.f32 %v968_v59 }
 0x434   : > { %1835 = vtanh.f32 %v963_v63 }
 0x438   : > { %v1830_v1 = vpop.eup %1829 }
 0x439   : > { %v1832_v2 = vpop.eup %1831  ;;  %v1000_v60 = vadd.f32 1.0, %v1830_v1 }
 0x43a   : > { %v999_v3 = vadd.f32 1.0, %v1832_v2 }
 0x43b   : > { %v1008_v61 = vmul.f32 0.5, %v1000_v60  ;;  %v1583_v0 = vpop.f32.mrb[12].mxu1 }
 0x43c   : > { %v1007_v4 = vmul.f32 0.5, %v999_v3  ;;  %v978_v5 = vadd.f32 %v1583_v0, %v1294_v53  ;;  %v972_v6 = vpop.f32.mrb[13].mxu1 }
 0x43d   : > { %v1834_v7 = vpop.eup %1833  ;;  %1017 = vst.msk [vmem:[%s2170_s13 + $0x8] sm:$0xff] %vm1015_vm0, %v1008_v61  ;;  %v973_v8 = vadd.f32 %v1294_v53, %v972_v6 }
 0x43e   : > { %v1836_v9 = vpop.eup %1835  ;;  %1016 = vst.msk [vmem:[%s2170_s13] sm:$0xff] %vm1015_vm0, %v1007_v4  ;;  %v1002_v10 = vadd.f32 1.0, %v1834_v7  ;;  %1837 = vtanh.f32 %v978_v5 }
 0x43f   : > { %v1001_v11 = vadd.f32 1.0, %v1836_v9  ;;  %1839 = vtanh.f32 %v973_v8 }
 0x440   : > { %v1010_v12 = vmul.f32 0.5, %v1002_v10 }
 0x441   : > { %v1009_v13 = vmul.f32 0.5, %v1001_v11 }
 0x442   : > { %1019 = vst.msk [vmem:[%s2170_s13 + $0x18] sm:$0xff] %vm1015_vm0, %v1010_v12 }
 0x443   : > { %1018 = vst.msk [vmem:[%s2170_s13 + $0x10] sm:$0xff] %vm1015_vm0, %v1009_v13 }
 0x445   : > { %v1586_v14 = vpop.f32.mrb[14].mxu1 }
 0x446   : > { %v988_v15 = vadd.f32 %v1586_v14, %v1294_v53  ;;  %v982_v16 = vpop.f32.mrb[15].mxu1 }
 0x447   : > { %v983_v17 = vadd.f32 %v1294_v53, %v982_v16 }
 0x448   : > { %v1838_v18 = vpop.eup %1837  ;;  %1841 = vtanh.f32 %v988_v15 }
 0x449   : > { %v1840_v19 = vpop.eup %1839  ;;  %v1004_v20 = vadd.f32 1.0, %v1838_v18  ;;  %1843 = vtanh.f32 %v983_v17 }
 0x44a   : > { %v1003_v21 = vadd.f32 1.0, %v1840_v19 }
 0x44b   : > { %v1012_v22 = vmul.f32 0.5, %v1004_v20 }
 0x44c   : > { %v1011_v23 = vmul.f32 0.5, %v1003_v21 }
 0x44d   : > { %1021 = vst.msk [vmem:[%s2170_s13 + $0x28] sm:$0xff] %vm1015_vm0, %v1012_v22 }
 0x44e   : > { %1020 = vst.msk [vmem:[%s2170_s13 + $0x20] sm:$0xff] %vm1015_vm0, %v1011_v23 }
 0x452   : > { %v1842_v24 = vpop.eup %1841  ;;  %1030 = sbr.rel (!%p2265_p6) target bundleno = 1162 (0x48a), region = 56 }
 0x453   : > { %v1844_v25 = vpop.eup %1843  ;;  %v1006_v26 = vadd.f32 1.0, %v1842_v24 }
 0x454   : > { %v1005_v27 = vadd.f32 1.0, %v1844_v25 }
 0x455   : > { %v1014_v28 = vmul.f32 0.5, %v1006_v26 }
 0x456   : > { %v1013_v29 = vmul.f32 0.5, %v1005_v27 }
 0x457   : > { %1023 = vst.msk [vmem:[%s2170_s13 + $0x38] sm:$0xff] %vm1015_vm0, %v1014_v28 }
 0x458   : > { %1022 = vst.msk [vmem:[%s2170_s13 + $0x30] sm:$0xff] %vm1015_vm0, %v1013_v29 }
 0x459   : > { %s2273_s24 = smov (!%p1033_p7, %s1032_s24), 8 }
 0x45a   : > { %s1297_s18 = sshll.u32 %s2273_s24, 7 }
 0x45b   : > { %p1300_p9 = scmp.eq.s32.totalorder %s1297_s18, 0 }
 0x45c   : > { %s2201_s19 = sshrl.u32 (!%p1300_p9), %s2273_s24, 3 }
 0x45d   : > { %1041 = sbr.rel (%p1300_p9) target bundleno = 1162 (0x48a), region = 60  ;;  %p1301_p13 = scmp.le.s32.totalorder (!%p1300_p9), %s2201_s19, 0 }
 0x464   : > { %1226 = sbr.rel (%p1301_p13) target bundleno = 1141 (0x475), region = 141  ;;  %s2266_s27 = smov (!%p1301_p13), %s2195_s17 }
 0x465   : > { %s2267_s9 = smov (!%p1301_p13), %s2170_s13  ;;  %s2210_s30 = smov (!%p1301_p13), 0  }
 0x466   : > { %s2212_s20 = smov (!%p1301_p13), 0  }
 0x46b LB: >> { %v1117_v30 = vld [vmem:[%s1939_s9] sm:$0xff]  ;;  %v1119_v31 = vld [vmem:[%s1939_s9 + $0x8] sm:$0xff]  ;;  %v1121_v32 = vld [vmem:[%s1939_s9 + $0x10] sm:$0xff]  ;;  %s1133_s21 = sadd.s32 1, %s1943_s30  ;;  %s1111_s20 = sadd.s32 1, %s1947_s20   ;;  %s1947_s20 = sphi %s2212_s20, %s1111_s20   ;;  %s1943_s30 = sphi %s2210_s30, %s2268_s30   ;;  %s1939_s9 = sphi %s2267_s9, %s1138_s9   ;;  %s1935_s27 = sphi %s2266_s27, %s1139_s27  }
 0x46c   : >> { %1118 = vst [vmem:[%s1935_s27] sm:$0xff] %v1117_v30  ;;  %1120 = vst [vmem:[%s1935_s27 + $0x8] sm:$0xff] %v1119_v31  ;;  %v1123_v33 = vld [vmem:[%s1939_s9 + $0x18] sm:$0xff]  ;;  %v1125_v34 = vld [vmem:[%s1939_s9 + $0x20] sm:$0xff]  ;;  %p1134_p0 = scmp.ge.s32.totalorder %s1133_s21, %s2201_s19  ;;  %p1110_p1 = scmp.ge.s32.totalorder %s1111_s20, %s2201_s19 }
 0x46d   : >> { %1122 = vst [vmem:[%s1935_s27 + $0x10] sm:$0xff] %v1121_v32  ;;  %v1127_v35 = vld [vmem:[%s1939_s9 + $0x28] sm:$0xff]  ;;  %1124 = vst [vmem:[%s1935_s27 + $0x18] sm:$0xff] %v1123_v33  ;;  %v1129_v36 = vld [vmem:[%s1939_s9 + $0x30] sm:$0xff] }
 0x46e   : >> { %1126 = vst [vmem:[%s1935_s27 + $0x20] sm:$0xff] %v1125_v34  ;;  %1128 = vst [vmem:[%s1935_s27 + $0x28] sm:$0xff] %v1127_v35  ;;  %v1131_v37 = vld [vmem:[%s1939_s9 + $0x38] sm:$0xff]  ;;  %s2275_s21 = smov (%p1134_p0, %s1133_s21), 0  ;;  %1113 = sbr.rel (!%p1110_p1) target bundleno = 1131 (0x46b), region = 147 }
 0x46f   : >> { %1130 = vst [vmem:[%s1935_s27 + $0x30] sm:$0xff] %v1129_v36  ;;  %1132 = vst [vmem:[%s1935_s27 + $0x38] sm:$0xff] %v1131_v37  ;;  %s1302_s22 = sshll.u32 %s2275_s21, 6  ;;  %s2268_s30 = smov %s2275_s21 }
 0x470   : >> { %s1138_s9 = scalar_lea.vmem %s2170_s13, %s1302_s22 [#allocation4]   ;;  %s1139_s27 = scalar_lea.vmem %s2195_s17, %s1302_s22  }
 0x475 PF: > { %s2231_s23 = sand.u32 7, %s2273_s24   ;;  %s1313_s26 = sshll.u32 %s2201_s19, 6 }
 0x476   : > { %s1144_s29 = scalar_lea.vmem %s2170_s13, %s1313_s26 [#allocation4]   ;;  %s1146_s10 = scalar_lea.vmem %s2195_s17, %s1313_s26  }
 0x477   : > { %p1307_p2 = scmp.le.s32.totalorder %s2231_s23, 0 }
 0x478   : > { %s1949_s11 = smov (!%p1307_p2), %s1146_s10   ;;  %s1953_s12 = smov (!%p1307_p2), %s1144_s29  }
 0x479   : > { %1240 = sbr.rel (%p1307_p2) target bundleno = 1162 (0x48a), region = 152  ;;  %s1957_s14 = smov (!%p1307_p2), 0  }
 0x47a   : > { %s1961_s15 = smov (!%p1307_p2), 0  }
 0x480 LB: >> { %v1156_v38 = vld [vmem:[%s1955_s12] sm:$0xff]  ;;  %s1158_s24 = sadd.s32 1, %s1959_s14  ;;  %s1150_s15 = sadd.s32 1, %s1963_s15   ;;  %s1963_s15 = sphi %s1961_s15, %s1150_s15   ;;  %s1959_s14 = sphi %s1957_s14, %s1958_s14   ;;  %s1955_s12 = sphi %s1953_s12, %s1163_s12   ;;  %s1951_s11 = sphi %s1949_s11, %s1164_s11  }
 0x481   : >> { %1157 = vst [vmem:[%s1951_s11] sm:$0xff] %v1156_v38  ;;  %p1159_p3 = scmp.ge.s32.totalorder %s1158_s24, %s2231_s23  ;;  %p1149_p5 = scmp.ge.s32.totalorder %s1150_s15, %s2231_s23 }
 0x483   : >> { %s2277_s24 = smov (%p1159_p3, %s1158_s24), 0  ;;  %1152 = sbr.rel (!%p1149_p5) target bundleno = 1152 (0x480), region = 158 }
 0x484   : >> { %s1308_s13 = sshll.u32 %s2277_s24, 3  ;;  %s1958_s14 = smov %s2277_s24  }
 0x485   : >> { %s1163_s12 = scalar_lea.vmem %s1144_s29, %s1308_s13 [#allocation4]   ;;  %s1164_s11 = scalar_lea.vmem %s1146_s10, %s1308_s13  }
 0x48a PF: > { %p15_p8 = scmp.ge.s32.totalorder %s2025_s28, 6   ;;  %s2269_s24 = smov %s1927_s25 }
 0x48b   : > { %s2270_s25 = smov %s2033_s8  ;;  %s2271_s26 = smov %s2025_s28 }
 0x48c   :  { %17 = sbr.rel (!%p15_p8) target bundleno = 2 (0x2), region = 169 }
 0x493   :  { %1180 = vsyncpa [#allocation3], 1 }
 0x494   :  { %1182 = vsyncpa [#allocation3 + $0x1], 1 }

</bundles_post_ra>
